<compile_context>
chip_gen: v7x
topology: tpu7x:2x2x1
jax: 0.10.0
libtpu: 0.0.40
codegen_flags: <defaults>
</compile_context>

<pallas_src>
import math
import functools

import jax
import jax.numpy as jnp
from jax.experimental import pallas as pl
from jax.experimental.pallas import tpu as pltpu


def _mha_kernel(q_ref, k_ref, v_ref, w_in_ref, b_in_ref, woT_ref, bo_ref, o_ref,
                *, n_heads, H, B, Lq, Lk):
    dh = n_heads                      # per-chunk ("head") feature width
    cdt = w_in_ref.dtype              # MXU operand dtype (bf16 fast path / f32 exact path)

    qf = q_ref[...].astype(cdt)       # [B*Lq, d_model]
    kf = k_ref[...].astype(cdt)       # [B*Lk, d_model]
    vf = v_ref[...].astype(cdt)       # [B*Lk, d_model]

    # Input projections y = x @ W^T + b.  W^T is host-prepared (truncated to the
    # H*dh columns actually used, with the 1/sqrt(n_heads) scale folded into
    # W_q/b_q), so these are plain last-axis contractions with fp32 accumulation.
    Qp = jnp.dot(qf, w_in_ref[0], preferred_element_type=jnp.float32) + b_in_ref[0]
    Kp = jnp.dot(kf, w_in_ref[1], preferred_element_type=jnp.float32) + b_in_ref[1]
    Vp = jnp.dot(vf, w_in_ref[2], preferred_element_type=jnp.float32) + b_in_ref[2]

    # Leading-dim-only reshapes (free): recover the batch axis.
    Qp = Qp.reshape(B, Lq, H * dh)
    Kp = Kp.reshape(B, Lk, H * dh)
    Vp = Vp.reshape(B, Lk, H * dh)

    # Head-batched layout [H*B, L, dh] (group g = h*B + b), built with static
    # lane slices + a leading-axis concat only (no minor-dim reshape/transpose).
    # torch.chunk(..., -1) semantics: head h = columns [h*dh, (h+1)*dh).
    Qh = jnp.concatenate([Qp[:, :, h * dh:(h + 1) * dh] for h in range(H)],
                         axis=0).astype(cdt)                      # [H*B, Lq, dh]
    Kh = jnp.concatenate([Kp[:, :, h * dh:(h + 1) * dh] for h in range(H)],
                         axis=0).astype(cdt)                      # [H*B, Lk, dh]
    Vh = jnp.concatenate([Vp[:, :, h * dh:(h + 1) * dh] for h in range(H)],
                         axis=0).astype(cdt)                      # [H*B, Lk, dh]

    # All heads in ONE batched score matmul + ONE softmax + ONE PV matmul.
    s = jnp.einsum('gqd,gkd->gqk', Qh, Kh,
                   preferred_element_type=jnp.float32)            # [H*B, Lq, Lk] f32
    # TODO(synk): attention-mask path not implemented (forward exercised with mask=None).
    m = jnp.max(s, axis=-1, keepdims=True)
    e = jnp.exp(s - m)                                            # fp32 softmax (v5e-safe)
    l = jnp.sum(e, axis=-1, keepdims=True)
    pv = jnp.einsum('gqk,gkd->gqd', e.astype(cdt), Vh,
                    preferred_element_type=jnp.float32)           # [H*B, Lq, dh] f32
    # Deferred normalization: one multiply on the small [*, Lq, dh] result.
    pv = pv * pl.reciprocal(l, approx=False)

    # Merge heads back to [B*Lq, H*dh] (h-major column order = torch.concat).
    concat = jnp.concatenate([pv[h * B:(h + 1) * B] for h in range(H)], axis=-1)
    concat = concat.reshape(B * Lq, H * dh).astype(cdt)           # leading-dim merge only

    out = jnp.dot(concat, woT_ref[...], preferred_element_type=jnp.float32) + bo_ref[...]
    # Dropout is the identity at inference time.
    o_ref[...] = out.astype(o_ref.dtype)


def prepare_params(params, *, d_k, d_v, n_heads, mxu_dtype=jnp.bfloat16):
    """One-time parameter prep (do NOT redo per forward call).

    Transposes the PyTorch-layout ([out, in]) weights, truncates W_q/W_k/W_v to
    the H = min(d_k, d_v) heads the reference's zip() actually uses, folds the
    1/sqrt(n_heads) scale into W_q/b_q, stacks the three input projections into
    one weight and one bias operand, and casts MXU weights to `mxu_dtype`
    (biases stay fp32: they are added after the fp32 accumulation).
    """
    wq, bq, wk, bk, wv, bv, wo, bo = params
    H = min(d_k, d_v)
    D = H * n_heads
    # The reference's w_o takes d_v*n_heads inputs; d_v > d_k would fail in torch too.
    assert d_v <= d_k, "d_v must be <= d_k for the reference forward to be well-formed"
    scale = 1.0 / math.sqrt(n_heads)

    w_in = jnp.stack([(wq.T[:, :D] * scale).astype(mxu_dtype),
                      wk.T[:, :D].astype(mxu_dtype),
                      wv.T[:, :D].astype(mxu_dtype)])             # [3, d_model, D]
    b_in = jnp.stack([(bq[:, :D] * scale).astype(jnp.float32),
                      bk[:, :D].astype(jnp.float32),
                      bv[:, :D].astype(jnp.float32)])             # [3, 1, D]
    woT = wo.T.astype(mxu_dtype)                                  # [D, d_model]
    bo_ = bo.astype(jnp.float32)                                  # [1, d_model]
    return w_in, b_in, woT, bo_


def multi_head_attention(q, k, v, prepped, *, d_k, d_v, n_heads):
    B, Lq, d_model = q.shape
    _, Lk, _ = k.shape
    w_in, b_in, woT, bo = prepped
    H = min(d_k, d_v)

    # Flatten batch and sequence into one row axis so the projections are
    # full-width MXU matmuls; attention is re-batched inside the kernel.
    qf = q.reshape(B * Lq, d_model)
    kf = k.reshape(B * Lk, d_model)
    vf = v.reshape(B * Lk, d_model)

    kernel = functools.partial(_mha_kernel, n_heads=n_heads, H=H, B=B, Lq=Lq, Lk=Lk)

    vmem_spec = pl.BlockSpec(memory_space=pltpu.MemorySpace.VMEM)
    out = pl.pallas_call(
        kernel,
        out_shape=jax.ShapeDtypeStruct((B * Lq, d_model), q.dtype),
        in_specs=[vmem_spec] * 7,
        out_specs=vmem_spec,
    )(qf, kf, vf, w_in, b_in, woT, bo)
    return out.reshape(B, Lq, d_model)


def reference_jax(q, k, v, params, *, d_k, d_v, n_heads):
    """Pure-JAX reference mirroring the PyTorch forward (eval mode)."""
    wq, bq, wk, bk, wv, bv, wo, bo = params
    Qp = q @ wq.T + bq[0]
    Kp = k @ wk.T + bk[0]
    Vp = v @ wv.T + bv[0]
    outs = []
    scale = 1.0 / math.sqrt(n_heads)
    for h in range(min(d_k, d_v)):
        Qh = Qp[..., h * n_heads:(h + 1) * n_heads]
        Kh = Kp[..., h * n_heads:(h + 1) * n_heads]
        Vh = Vp[..., h * n_heads:(h + 1) * n_heads]
        s = jnp.einsum('bqd,bkd->bqk', Qh, Kh) * scale
        p = jax.nn.softmax(s, axis=-1)
        outs.append(jnp.einsum('bqk,bkd->bqd', p, Vh))
    return jnp.concatenate(outs, axis=-1) @ wo.T + bo[0]


def init_params(key, d_model, d_k, d_v, n_heads, dtype=jnp.float32):
    """Deterministic synthetic parameters (PyTorch nn.Linear shapes)."""
    ks = jax.random.split(key, 8)

    def linear(kw, kb, out_f, in_f):
        bound = 1.0 / math.sqrt(in_f)
        w = jax.random.uniform(kw, (out_f, in_f), dtype, -bound, bound)
        b = jax.random.uniform(kb, (1, out_f), dtype, -bound, bound)
        return w, b

    wq, bq = linear(ks[0], ks[1], d_k * n_heads, d_model)
    wk, bk = linear(ks[2], ks[3], d_k * n_heads, d_model)
    wv, bv = linear(ks[4], ks[5], d_v * n_heads, d_model)
    wo, bo = linear(ks[6], ks[7], d_model, d_v * n_heads)
    return (wq, bq, wk, bk, wv, bv, wo, bo)


if __name__ == "__main__":
    # Small, module-consistent shapes.
    B, Lq, Lk = 2, 8, 8
    d_model, d_k, d_v, n_heads = 32, 8, 8, 4   # d_model % n_heads == 0; d_k == d_v so
                                               # the reference's chunk/zip/concat is consistent.
    key = jax.random.PRNGKey(0)
    kq, kk, kv, kp = jax.random.split(key, 4)

    q = jax.random.normal(kq, (B, Lq, d_model), jnp.float32)
    k = jax.random.normal(kk, (B, Lk, d_model), jnp.float32)
    v = jax.random.normal(kv, (B, Lk, d_model), jnp.float32)
    params = init_params(kp, d_model, d_k, d_v, n_heads)
    ref = reference_jax(q, k, v, params, d_k=d_k, d_v=d_v, n_heads=n_heads)

    # Exact fp32 path (tight tolerance).
    prepped_f32 = prepare_params(params, d_k=d_k, d_v=d_v, n_heads=n_heads,
                                 mxu_dtype=jnp.float32)
    out_f32 = jax.block_until_ready(
        multi_head_attention(q, k, v, prepped_f32, d_k=d_k, d_v=d_v, n_heads=n_heads))
    assert out_f32.shape == (B, Lq, d_model)
    assert jnp.allclose(out_f32, ref, atol=1e-4, rtol=1e-4), "fp32 path mismatch vs JAX reference"

    # Fast bf16-MXU path (fp32 accumulation; bf16-appropriate tolerance).
    prepped_bf16 = prepare_params(params, d_k=d_k, d_v=d_v, n_heads=n_heads,
                                  mxu_dtype=jnp.bfloat16)
    out_bf16 = jax.block_until_ready(
        multi_head_attention(q, k, v, prepped_bf16, d_k=d_k, d_v=d_v, n_heads=n_heads))
    assert out_bf16.shape == (B, Lq, d_model)
    assert jnp.allclose(out_bf16, ref, atol=3e-2, rtol=3e-2), "bf16 path mismatch vs JAX reference"

    print("KERNEL_OK")
</pallas_src>

<mosaic_0001>
module attributes {stable_mosaic.version = 11 : i64} {
  func.func @_mha_kernel(%arg0: memref<16x32xf32, #tpu.memory_space<vmem>>, %arg1: memref<16x32xf32, #tpu.memory_space<vmem>>, %arg2: memref<16x32xf32, #tpu.memory_space<vmem>>, %arg3: memref<3x32x32xf32, #tpu.memory_space<vmem>>, %arg4: memref<3x1x32xf32, #tpu.memory_space<vmem>>, %arg5: memref<32x32xf32, #tpu.memory_space<vmem>>, %arg6: memref<1x32xf32, #tpu.memory_space<vmem>>, %arg7: memref<16x32xf32, #tpu.memory_space<vmem>>) attributes {dimension_semantics = [], scalar_prefetch = 0 : i64, scratch_operands = 0 : i64, tpu.core_type = #tpu.core_type<tc>} {
    %c0 = arith.constant 0 : index
    %c0_0 = arith.constant 0 : index
    %0 = vector.load %arg0[%c0, %c0_0] : memref<16x32xf32, #tpu.memory_space<vmem>>, vector<16x32xf32>
    %c0_1 = arith.constant 0 : index
    %c0_2 = arith.constant 0 : index
    %1 = vector.load %arg1[%c0_1, %c0_2] : memref<16x32xf32, #tpu.memory_space<vmem>>, vector<16x32xf32>
    %c0_3 = arith.constant 0 : index
    %c0_4 = arith.constant 0 : index
    %2 = vector.load %arg2[%c0_3, %c0_4] : memref<16x32xf32, #tpu.memory_space<vmem>>, vector<16x32xf32>
    %c0_5 = arith.constant 0 : index
    %c0_6 = arith.constant 0 : index
    %c0_7 = arith.constant 0 : index
    %3 = vector.load %arg3[%c0_5, %c0_6, %c0_7] : memref<3x32x32xf32, #tpu.memory_space<vmem>>, vector<1x32x32xf32>
    %4 = vector.shape_cast %3 : vector<1x32x32xf32> to vector<32x32xf32>
    %cst = arith.constant dense<0.000000e+00> : vector<16x32xf32>
    %5 = tpu.matmul %0, %4, %cst {dimension_numbers = #tpu.dot_dimension_numbers<[1], [0], [0], [1], [0, 0, 1, 1], [], []>} : vector<16x32xf32>, vector<32x32xf32>, vector<16x32xf32> -> vector<16x32xf32>
    %c0_8 = arith.constant 0 : index
    %c0_9 = arith.constant 0 : index
    %c0_10 = arith.constant 0 : index
    %6 = vector.load %arg4[%c0_8, %c0_9, %c0_10] : memref<3x1x32xf32, #tpu.memory_space<vmem>>, vector<1x1x32xf32>
    %7 = vector.shape_cast %6 : vector<1x1x32xf32> to vector<1x32xf32>
    %8 = vector.broadcast %7 : vector<1x32xf32> to vector<16x32xf32>
    %9 = arith.addf %5, %8 : vector<16x32xf32>
    %c1 = arith.constant 1 : index
    %c0_11 = arith.constant 0 : index
    %c0_12 = arith.constant 0 : index
    %10 = vector.load %arg3[%c1, %c0_11, %c0_12] : memref<3x32x32xf32, #tpu.memory_space<vmem>>, vector<1x32x32xf32>
    %11 = vector.shape_cast %10 : vector<1x32x32xf32> to vector<32x32xf32>
    %cst_13 = arith.constant dense<0.000000e+00> : vector<16x32xf32>
    %12 = tpu.matmul %1, %11, %cst_13 {dimension_numbers = #tpu.dot_dimension_numbers<[1], [0], [0], [1], [0, 0, 1, 1], [], []>} : vector<16x32xf32>, vector<32x32xf32>, vector<16x32xf32> -> vector<16x32xf32>
    %c1_14 = arith.constant 1 : index
    %c0_15 = arith.constant 0 : index
    %c0_16 = arith.constant 0 : index
    %13 = vector.load %arg4[%c1_14, %c0_15, %c0_16] : memref<3x1x32xf32, #tpu.memory_space<vmem>>, vector<1x1x32xf32>
    %14 = vector.shape_cast %13 : vector<1x1x32xf32> to vector<1x32xf32>
    %15 = vector.broadcast %14 : vector<1x32xf32> to vector<16x32xf32>
    %16 = arith.addf %12, %15 : vector<16x32xf32>
    %c2 = arith.constant 2 : index
    %c0_17 = arith.constant 0 : index
    %c0_18 = arith.constant 0 : index
    %17 = vector.load %arg3[%c2, %c0_17, %c0_18] : memref<3x32x32xf32, #tpu.memory_space<vmem>>, vector<1x32x32xf32>
    %18 = vector.shape_cast %17 : vector<1x32x32xf32> to vector<32x32xf32>
    %cst_19 = arith.constant dense<0.000000e+00> : vector<16x32xf32>
    %19 = tpu.matmul %2, %18, %cst_19 {dimension_numbers = #tpu.dot_dimension_numbers<[1], [0], [0], [1], [0, 0, 1, 1], [], []>} : vector<16x32xf32>, vector<32x32xf32>, vector<16x32xf32> -> vector<16x32xf32>
    %c2_20 = arith.constant 2 : index
    %c0_21 = arith.constant 0 : index
    %c0_22 = arith.constant 0 : index
    %20 = vector.load %arg4[%c2_20, %c0_21, %c0_22] : memref<3x1x32xf32, #tpu.memory_space<vmem>>, vector<1x1x32xf32>
    %21 = vector.shape_cast %20 : vector<1x1x32xf32> to vector<1x32xf32>
    %22 = vector.broadcast %21 : vector<1x32xf32> to vector<16x32xf32>
    %23 = arith.addf %19, %22 : vector<16x32xf32>
    %24 = vector.shape_cast %9 : vector<16x32xf32> to vector<2x8x32xf32>
    %25 = vector.shape_cast %16 : vector<16x32xf32> to vector<2x8x32xf32>
    %26 = vector.shape_cast %23 : vector<16x32xf32> to vector<2x8x32xf32>
    %27 = vector.extract_strided_slice %24 {offsets = [0, 0, 0], sizes = [2, 8, 4], strides = [1, 1, 1]} : vector<2x8x32xf32> to vector<2x8x4xf32>
    %28 = vector.extract_strided_slice %24 {offsets = [0, 0, 4], sizes = [2, 8, 4], strides = [1, 1, 1]} : vector<2x8x32xf32> to vector<2x8x4xf32>
    %29 = vector.extract_strided_slice %24 {offsets = [0, 0, 8], sizes = [2, 8, 4], strides = [1, 1, 1]} : vector<2x8x32xf32> to vector<2x8x4xf32>
    %30 = vector.extract_strided_slice %24 {offsets = [0, 0, 12], sizes = [2, 8, 4], strides = [1, 1, 1]} : vector<2x8x32xf32> to vector<2x8x4xf32>
    %31 = vector.extract_strided_slice %24 {offsets = [0, 0, 16], sizes = [2, 8, 4], strides = [1, 1, 1]} : vector<2x8x32xf32> to vector<2x8x4xf32>
    %32 = vector.extract_strided_slice %24 {offsets = [0, 0, 20], sizes = [2, 8, 4], strides = [1, 1, 1]} : vector<2x8x32xf32> to vector<2x8x4xf32>
    %33 = vector.extract_strided_slice %24 {offsets = [0, 0, 24], sizes = [2, 8, 4], strides = [1, 1, 1]} : vector<2x8x32xf32> to vector<2x8x4xf32>
    %34 = vector.extract_strided_slice %24 {offsets = [0, 0, 28], sizes = [2, 8, 4], strides = [1, 1, 1]} : vector<2x8x32xf32> to vector<2x8x4xf32>
    %35 = tpu.concatenate %27, %28, %29, %30, %31, %32, %33, %34 in 0 : vector<2x8x4xf32>, vector<2x8x4xf32>, vector<2x8x4xf32>, vector<2x8x4xf32>, vector<2x8x4xf32>, vector<2x8x4xf32>, vector<2x8x4xf32>, vector<2x8x4xf32> -> vector<16x8x4xf32>
    %36 = vector.extract_strided_slice %25 {offsets = [0, 0, 0], sizes = [2, 8, 4], strides = [1, 1, 1]} : vector<2x8x32xf32> to vector<2x8x4xf32>
    %37 = vector.extract_strided_slice %25 {offsets = [0, 0, 4], sizes = [2, 8, 4], strides = [1, 1, 1]} : vector<2x8x32xf32> to vector<2x8x4xf32>
    %38 = vector.extract_strided_slice %25 {offsets = [0, 0, 8], sizes = [2, 8, 4], strides = [1, 1, 1]} : vector<2x8x32xf32> to vector<2x8x4xf32>
    %39 = vector.extract_strided_slice %25 {offsets = [0, 0, 12], sizes = [2, 8, 4], strides = [1, 1, 1]} : vector<2x8x32xf32> to vector<2x8x4xf32>
    %40 = vector.extract_strided_slice %25 {offsets = [0, 0, 16], sizes = [2, 8, 4], strides = [1, 1, 1]} : vector<2x8x32xf32> to vector<2x8x4xf32>
    %41 = vector.extract_strided_slice %25 {offsets = [0, 0, 20], sizes = [2, 8, 4], strides = [1, 1, 1]} : vector<2x8x32xf32> to vector<2x8x4xf32>
    %42 = vector.extract_strided_slice %25 {offsets = [0, 0, 24], sizes = [2, 8, 4], strides = [1, 1, 1]} : vector<2x8x32xf32> to vector<2x8x4xf32>
    %43 = vector.extract_strided_slice %25 {offsets = [0, 0, 28], sizes = [2, 8, 4], strides = [1, 1, 1]} : vector<2x8x32xf32> to vector<2x8x4xf32>
    %44 = tpu.concatenate %36, %37, %38, %39, %40, %41, %42, %43 in 0 : vector<2x8x4xf32>, vector<2x8x4xf32>, vector<2x8x4xf32>, vector<2x8x4xf32>, vector<2x8x4xf32>, vector<2x8x4xf32>, vector<2x8x4xf32>, vector<2x8x4xf32> -> vector<16x8x4xf32>
    %45 = vector.extract_strided_slice %26 {offsets = [0, 0, 0], sizes = [2, 8, 4], strides = [1, 1, 1]} : vector<2x8x32xf32> to vector<2x8x4xf32>
    %46 = vector.extract_strided_slice %26 {offsets = [0, 0, 4], sizes = [2, 8, 4], strides = [1, 1, 1]} : vector<2x8x32xf32> to vector<2x8x4xf32>
    %47 = vector.extract_strided_slice %26 {offsets = [0, 0, 8], sizes = [2, 8, 4], strides = [1, 1, 1]} : vector<2x8x32xf32> to vector<2x8x4xf32>
    %48 = vector.extract_strided_slice %26 {offsets = [0, 0, 12], sizes = [2, 8, 4], strides = [1, 1, 1]} : vector<2x8x32xf32> to vector<2x8x4xf32>
    %49 = vector.extract_strided_slice %26 {offsets = [0, 0, 16], sizes = [2, 8, 4], strides = [1, 1, 1]} : vector<2x8x32xf32> to vector<2x8x4xf32>
    %50 = vector.extract_strided_slice %26 {offsets = [0, 0, 20], sizes = [2, 8, 4], strides = [1, 1, 1]} : vector<2x8x32xf32> to vector<2x8x4xf32>
    %51 = vector.extract_strided_slice %26 {offsets = [0, 0, 24], sizes = [2, 8, 4], strides = [1, 1, 1]} : vector<2x8x32xf32> to vector<2x8x4xf32>
    %52 = vector.extract_strided_slice %26 {offsets = [0, 0, 28], sizes = [2, 8, 4], strides = [1, 1, 1]} : vector<2x8x32xf32> to vector<2x8x4xf32>
    %53 = tpu.concatenate %45, %46, %47, %48, %49, %50, %51, %52 in 0 : vector<2x8x4xf32>, vector<2x8x4xf32>, vector<2x8x4xf32>, vector<2x8x4xf32>, vector<2x8x4xf32>, vector<2x8x4xf32>, vector<2x8x4xf32>, vector<2x8x4xf32> -> vector<16x8x4xf32>
    "tpu.trace_start"() <{level = 10 : i32, message = "gqd,gkd->gqk"}> : () -> ()
    %cst_23 = arith.constant dense<0.000000e+00> : vector<16x8x8xf32>
    %54 = tpu.matmul %35, %44, %cst_23 {dimension_numbers = #tpu.dot_dimension_numbers<[2], [2], [1], [1], [0, 0, 0, 1, 1, 1], [0], [0]>} : vector<16x8x4xf32>, vector<16x8x4xf32>, vector<16x8x8xf32> -> vector<16x8x8xf32>
    "tpu.trace_stop"() : () -> ()
    %cst_24 = arith.constant dense<0xFF800000> : vector<16x8xf32>
    %55 = vector.multi_reduction <maximumf>, %54, %cst_24 [2] : vector<16x8x8xf32> to vector<16x8xf32>
    %56 = vector.shape_cast %55 : vector<16x8xf32> to vector<16x8x1xf32>
    %57 = vector.broadcast %56 : vector<16x8x1xf32> to vector<16x8x8xf32>
    %58 = arith.subf %54, %57 : vector<16x8x8xf32>
    %59 = math.exp %58 : vector<16x8x8xf32>
    %cst_25 = arith.constant dense<0.000000e+00> : vector<16x8xf32>
    %60 = vector.multi_reduction <add>, %59, %cst_25 [2] : vector<16x8x8xf32> to vector<16x8xf32>
    %61 = vector.shape_cast %60 : vector<16x8xf32> to vector<16x8x1xf32>
    "tpu.trace_start"() <{level = 10 : i32, message = "gqk,gkd->gqd"}> : () -> ()
    %cst_26 = arith.constant dense<0.000000e+00> : vector<16x8x4xf32>
    %62 = tpu.matmul %59, %53, %cst_26 {dimension_numbers = #tpu.dot_dimension_numbers<[2], [1], [1], [2], [0, 0, 0, 1, 1, 2], [0], [0]>} : vector<16x8x8xf32>, vector<16x8x4xf32>, vector<16x8x4xf32> -> vector<16x8x4xf32>
    "tpu.trace_stop"() : () -> ()
    %63 = tpu.reciprocal %61 : vector<16x8x1xf32> -> vector<16x8x1xf32>
    %64 = vector.broadcast %63 : vector<16x8x1xf32> to vector<16x8x4xf32>
    %65 = arith.mulf %62, %64 : vector<16x8x4xf32>
    %66 = vector.extract_strided_slice %65 {offsets = [0, 0, 0], sizes = [2, 8, 4], strides = [1, 1, 1]} : vector<16x8x4xf32> to vector<2x8x4xf32>
    %67 = vector.extract_strided_slice %65 {offsets = [2, 0, 0], sizes = [2, 8, 4], strides = [1, 1, 1]} : vector<16x8x4xf32> to vector<2x8x4xf32>
    %68 = vector.extract_strided_slice %65 {offsets = [4, 0, 0], sizes = [2, 8, 4], strides = [1, 1, 1]} : vector<16x8x4xf32> to vector<2x8x4xf32>
    %69 = vector.extract_strided_slice %65 {offsets = [6, 0, 0], sizes = [2, 8, 4], strides = [1, 1, 1]} : vector<16x8x4xf32> to vector<2x8x4xf32>
    %70 = vector.extract_strided_slice %65 {offsets = [8, 0, 0], sizes = [2, 8, 4], strides = [1, 1, 1]} : vector<16x8x4xf32> to vector<2x8x4xf32>
    %71 = vector.extract_strided_slice %65 {offsets = [10, 0, 0], sizes = [2, 8, 4], strides = [1, 1, 1]} : vector<16x8x4xf32> to vector<2x8x4xf32>
    %72 = vector.extract_strided_slice %65 {offsets = [12, 0, 0], sizes = [2, 8, 4], strides = [1, 1, 1]} : vector<16x8x4xf32> to vector<2x8x4xf32>
    %73 = vector.extract_strided_slice %65 {offsets = [14, 0, 0], sizes = [2, 8, 4], strides = [1, 1, 1]} : vector<16x8x4xf32> to vector<2x8x4xf32>
    %74 = tpu.concatenate %66, %67, %68, %69, %70, %71, %72, %73 in 2 : vector<2x8x4xf32>, vector<2x8x4xf32>, vector<2x8x4xf32>, vector<2x8x4xf32>, vector<2x8x4xf32>, vector<2x8x4xf32>, vector<2x8x4xf32>, vector<2x8x4xf32> -> vector<2x8x32xf32>
    %75 = vector.shape_cast %74 : vector<2x8x32xf32> to vector<16x32xf32>
    %c0_27 = arith.constant 0 : index
    %c0_28 = arith.constant 0 : index
    %76 = vector.load %arg5[%c0_27, %c0_28] : memref<32x32xf32, #tpu.memory_space<vmem>>, vector<32x32xf32>
    %cst_29 = arith.constant dense<0.000000e+00> : vector<16x32xf32>
    %77 = tpu.matmul %75, %76, %cst_29 {dimension_numbers = #tpu.dot_dimension_numbers<[1], [0], [0], [1], [0, 0, 1, 1], [], []>} : vector<16x32xf32>, vector<32x32xf32>, vector<16x32xf32> -> vector<16x32xf32>
    %c0_30 = arith.constant 0 : index
    %c0_31 = arith.constant 0 : index
    %78 = vector.load %arg6[%c0_30, %c0_31] : memref<1x32xf32, #tpu.memory_space<vmem>>, vector<1x32xf32>
    %79 = vector.broadcast %78 : vector<1x32xf32> to vector<16x32xf32>
    %80 = arith.addf %77, %79 : vector<16x32xf32>
    %c0_32 = arith.constant 0 : index
    %c0_33 = arith.constant 0 : index
    %81 = vector.load %arg7[%c0_32, %c0_33] : memref<16x32xf32, #tpu.memory_space<vmem>>, vector<16x32xf32>
    tpu.vector_store %arg7[%c0_32, %c0_33], %80 {strides = array<i32>} : memref<16x32xf32, #tpu.memory_space<vmem>>, vector<16x32xf32>,
    return
  }
}

</mosaic_0001>

<bundles_post_ra>
// kernel: tpu_custom_call.1
= control target key start
LH: loop header
LB: loop body
LE: loop exit
PB: predicated region body
PF: predicated region fallthrough
CT: control target
= control target key end

     0   :  { %12 = vsyncpa [#allocation3], 0  ;;  %s4335_s0 = inlined_call_operand.hbm [shape: f32[16,32], index: 0, kind: input, shape index: {}]   ;;  %s4336_s1 = inlined_call_operand.hbm [shape: f32[16,32], index: 1, kind: input, shape index: {}]   ;;  %s4337_s2 = inlined_call_operand.hbm [shape: f32[16,32], index: 2, kind: input, shape index: {}]   ;;  %s4338_s3 = inlined_call_operand.hbm [shape: f32[3,32,32], index: 3, kind: input, shape index: {}]   ;;  %s4339_s4 = inlined_call_operand.vmem [shape: f32[3,1,32], index: 4, kind: input, shape index: {}]   ;;  %s4340_s5 = inlined_call_operand.hbm [shape: f32[32,32], index: 5, kind: input, shape index: {}]   ;;  %s4341_s6 = inlined_call_operand.vmem [shape: f32[1,32], index: 6, kind: input, shape index: {}]   ;;  %s4342_s7 = inlined_call_operand.hbm [shape: f32[16,32], index: 7, kind: output, shape index: {}]  }
   0x1   :  { %13 = vsyncpa [#allocation6], 0 }
   0x2   :  { %14 = vsyncpa [#allocation9], 0 }
   0x3   :  { %15 = vsyncpa [#allocation4], 0  ;;  %s3817_s24 = smov [#allocation5]   ;;  %s3818_s26 = smov [#allocation8]  }
   0x4   :  { %s33_s25 = sshll.u32 %s3817_s24, 4  ;;  %s57_s27 = sshll.u32 %s3818_s26, 4  ;;  %s34_s25 = int_to_ptr.vmem [resolvable:$true] %s33_s25  ;;  %s3880_s27 = int_to_ptr.vmem [resolvable:$true] %s57_s27 }
   0x5   :  { %s3677_s30 = scalar_lea.hbm %s4336_s1, 256 }
   0x6   :  { %p3678_p0 = scmp.ne.s32.totalorder %s4336_s1, %s3677_s30  ;;  %p3681_p1 = scmp.lt.u32.totalorder %s3677_s30, %s4336_s1 }
   0x8   :  { %p3683_p2 = pnand %p3681_p1, %p3678_p0 }
   0xa   :  { %3686 = shalt.err (!%p3683_p2)
}
   0xb   :  { %s3687_s12 = scalar_lea.vmem %s34_s25, 256  ;;  %p3692_p4 = scmp.lt.s32.totalorder %s34_s25, %s34_s25 }
   0xc   :  { %p3688_p3 = scmp.ne.s32.totalorder %s34_s25, %s3687_s12  ;;  %p3693_p5 = scmp.lt.s32.totalorder %s3687_s12, %s3687_s12 }
   0xe   :  { %p3694_p6 = por %p3693_p5, %p3692_p4 }
  0x10   :  { %p3695_p7 = pnand %p3694_p6, %p3688_p3 }
  0x12   :  { %3698 = shalt.err (!%p3695_p7)
}
  0x13   :  { %s3819_s13 = smov 128   ;;  %s3820_s14 = smov 8  }
  0x14   :  { %39 = dma.hbm_to_vmem [thread:$0]  %s4336_s1, 256, %s34_s25, [#allocation6], %s3819_s13, %s3819_s13, %s3820_s14  }
  0x15   :  { %s3699_s19 = scalar_lea.hbm %s4338_s3, 1536 }
  0x16   :  { %p3700_p8 = scmp.ne.s32.totalorder %s4338_s3, %s3699_s19  ;;  %p3703_p9 = scmp.lt.u32.totalorder %s3699_s19, %s4338_s3 }
  0x18   :  { %p3705_p10 = pnand %p3703_p9, %p3700_p8 }
  0x1a   :  { %3708 = shalt.err (!%p3705_p10)
}
  0x1b   :  { %s3709_s24 = scalar_lea.vmem %s3880_s27, 1536  ;;  %p3714_p12 = scmp.lt.s32.totalorder %s3880_s27, %s3880_s27 }
  0x1c   :  { %p3710_p11 = scmp.ne.s32.totalorder %s3880_s27, %s3709_s24  ;;  %p3715_p13 = scmp.lt.s32.totalorder %s3709_s24, %s3709_s24 }
  0x1e   :  { %p3716_p0 = por %p3715_p13, %p3714_p12 }
  0x20   :  { %p3717_p1 = pnand %p3716_p0, %p3710_p11 }
  0x22   :  { %3720 = shalt.err (!%p3717_p1)
}
  0x23   :  { %63 = dma.hbm_to_vmem [thread:$0]  %s4338_s3, 1536, %s3880_s27, [#allocation9], %s3819_s13, %s3819_s13, %s3820_s14  }
  0x24   :  { %s3821_s26 = smov [#allocation2]   ;;  %s3822_s29 = smov [#allocation7]  }
  0x25   :  { %s21_s28 = sshll.u32 %s3821_s26, 4  ;;  %s45_s30 = sshll.u32 %s3822_s29, 4  ;;  %s22_s28 = int_to_ptr.vmem [resolvable:$true] %s21_s28  ;;  %s3917_s30 = int_to_ptr.vmem [resolvable:$true] %s45_s30 }
  0x26   :  { %s3721_s10 = scalar_lea.hbm %s4335_s0, 256 }
  0x27   :  { %p3722_p2 = scmp.ne.s32.totalorder %s4335_s0, %s3721_s10  ;;  %p3725_p3 = scmp.lt.u32.totalorder %s3721_s10, %s4335_s0 }
  0x29   :  { %p3727_p4 = pnand %p3725_p3, %p3722_p2 }
  0x2b   :  { %3730 = shalt.err (!%p3727_p4)
}
  0x2c   :  { %s3731_s3 = scalar_lea.vmem %s22_s28, 256  ;;  %p3736_p6 = scmp.lt.s32.totalorder %s22_s28, %s22_s28 }
  0x2d   :  { %p3732_p5 = scmp.ne.s32.totalorder %s22_s28, %s3731_s3  ;;  %p3737_p7 = scmp.lt.s32.totalorder %s3731_s3, %s3731_s3 }
  0x2f   :  { %p3738_p8 = por %p3737_p7, %p3736_p6 }
  0x31   :  { %p3739_p9 = pnand %p3738_p8, %p3732_p5 }
  0x33   :  { %3742 = shalt.err (!%p3739_p9)
}
  0x34   :  { %27 = dma.hbm_to_vmem [thread:$0]  %s4335_s0, 256, %s22_s28, [#allocation3], %s3819_s13, %s3819_s13, %s3820_s14  }
  0x35   :  { %s3743_s20 = scalar_lea.hbm %s4337_s2, 256 }
  0x36   :  { %p3744_p10 = scmp.ne.s32.totalorder %s4337_s2, %s3743_s20  ;;  %p3747_p11 = scmp.lt.u32.totalorder %s3743_s20, %s4337_s2 }
  0x38   :  { %p3749_p12 = pnand %p3747_p11, %p3744_p10 }
  0x3a   :  { %3752 = shalt.err (!%p3749_p12)
}
  0x3b   :  { %s3753_s1 = scalar_lea.vmem %s3917_s30, 256  ;;  %p3758_p0 = scmp.lt.s32.totalorder %s3917_s30, %s3917_s30 }
  0x3c   :  { %p3754_p13 = scmp.ne.s32.totalorder %s3917_s30, %s3753_s1  ;;  %p3759_p1 = scmp.lt.s32.totalorder %s3753_s1, %s3753_s1 }
  0x3e   :  { %p3760_p2 = por %p3759_p1, %p3758_p0 }
  0x40   :  { %p3761_p3 = pnand %p3760_p2, %p3754_p13 }
  0x42   :  { %3764 = shalt.err (!%p3761_p3)
}
  0x43   :  { %51 = dma.hbm_to_vmem [thread:$0]  %s4337_s2, 256, %s3917_s30, [#allocation6], %s3819_s13, %s3819_s13, %s3820_s14  }
  0x44   :  { %s3823_s26 = smov [#allocation10]   ;;  %s3765_s9 = scalar_lea.hbm %s4340_s5, 512 }
  0x45   :  { %s71_s28 = sshll.u32 %s3823_s26, 4  ;;  %p3766_p4 = scmp.ne.s32.totalorder %s4340_s5, %s3765_s9  ;;  %s72_s28 = int_to_ptr.vmem [resolvable:$true] %s71_s28 }
  0x46   :  { %p3769_p5 = scmp.lt.u32.totalorder %s3765_s9, %s4340_s5 }
  0x48   :  { %p3771_p6 = pnand %p3769_p5, %p3766_p4 }
  0x4a   :  { %3774 = shalt.err (!%p3771_p6)
}
  0x4b   :  { %s3775_s16 = scalar_lea.vmem %s72_s28, 512  ;;  %p3780_p8 = scmp.lt.s32.totalorder %s72_s28, %s72_s28 }
  0x4c   :  { %p3776_p7 = scmp.ne.s32.totalorder %s72_s28, %s3775_s16  ;;  %p3781_p9 = scmp.lt.s32.totalorder %s3775_s16, %s3775_s16 }
  0x4e   :  { %p3782_p10 = por %p3781_p9, %p3780_p8 }
  0x50   :  { %p3783_p11 = pnand %p3782_p10, %p3776_p7 }
  0x52   :  { %3786 = shalt.err (!%p3783_p11)
}
  0x53   :  { %77 = dma.hbm_to_vmem [thread:$0]  %s4340_s5, 512, %s72_s28, [#allocation9], %s3819_s13, %s3819_s13, %s3820_s14  }
  0x54   :  { %3809 = dma.done.wait [#allocation3], 256  }
  0x55   :  { %3810 = vsyncadd [#allocation3], 4294967040 }
  0x56   :  { %3811 = dma.done.wait [#allocation6], 512  }
  0x57   :  { %3812 = vsyncadd [#allocation6], 4294966784 }
  0x58   :  { %3813 = dma.done.wait [#allocation9], 2048  }
  0x59   :  { %3814 = vsyncadd [#allocation9], 4294965248  ;;  %v195_v0 = vld [vmem:[#allocation8 + $0x20] sm:$0xff]  ;;  %v196_v1 = vld [vmem:[#allocation8 + $0x28] sm:$0xff]  ;;  %vm112_vm0 = vcmask 261120   ;;  %v3824_v24 = vmov 0.0  }
  0x5a   :  { %v101_v2 = vld [vmem:[#allocation8] sm:$0xff]  ;;  %v3566_v3 = vpack.c.bf16 %v196_v1, %v195_v0  ;;  %v102_v4 = vld [vmem:[#allocation8 + $0x8] sm:$0xff]  ;;  %v197_v5 = vld [vmem:[#allocation8 + $0x30] sm:$0xff]  ;;  %vm3825_vm1 = vmmov 0   ;;  %vm486_vm2 = vcmask 31744   ;;  %s3826_s18 = smov 124  }
  0x5b   :  { %v198_v6 = vld [vmem:[#allocation8 + $0x38] sm:$0xff]  ;;  %v3558_v7 = vpack.c.bf16 %v102_v4, %v101_v2  ;;  %v103_v9 = vld [vmem:[#allocation8 + $0x10] sm:$0xff]  ;;  %v97_v11 = vld [vmem:[#allocation5] sm:$0xff]  ;;  %s3827_s19 = smov 120   ;;  %s3828_s20 = smov 116   ;;  %vm1671_vm3 = vcmask 64512  }
  0x5c   :  { %v3570_v8 = vpack.c.bf16 %v198_v6, %v197_v5  ;;  %v104_v10 = vld [vmem:[#allocation8 + $0x18] sm:$0xff]  ;;  %3567 = vmatprep.subr.bf16.mxu1 %v3566_v3  ;;  %3373 = vmatprep.mubr.msk.f32.mxu1 %vm112_vm0, %v97_v11  ;;  %v95_v13 = vld [vmem:[#allocation2] sm:$0xff]  ;;  %v289_v14 = vld [vmem:[#allocation8 + $0x40] sm:$0xff]  ;;  %s3829_s21 = smov 112   ;;  %s3830_s22 = smov 108   ;;  %vm3076_vm4 = vcmask 97280  }
  0x5d   :  { %v3562_v12 = vpack.c.bf16 %v104_v10, %v103_v9  ;;  %3569 = vmatpush3.bf16.msra.mxu1 %v3566_v3  ;;  %3559 = vmatprep.subr.bf16.mxu0 %v3558_v7  ;;  %v290_v15 = vld [vmem:[#allocation8 + $0x48] sm:$0xff]  ;;  %v291_v17 = vld [vmem:[#allocation8 + $0x50] sm:$0xff]  ;;  %v292_v18 = vld [vmem:[#allocation8 + $0x58] sm:$0xff]  ;;  %s3831_s23 = smov 104   ;;  %s3832_s24 = smov 100   ;;  %vm3079_vm5 = vcmask 130048  }
  0x5e   :  { %3561 = vmatpush3.bf16.msra.mxu0 %v3558_v7  ;;  %3571 = vmatprep.subr.bf16.mxu1 %v3570_v8  ;;  %v3574_v16 = vpack.c.bf16 %v290_v15, %v289_v14  ;;  %v98_v19 = vld [vmem:[#allocation5 + $0x8] sm:$0xff]  ;;  %v96_v20 = vld [vmem:[#allocation2 + $0x8] sm:$0xff]  ;;  %v3578_v21 = vpack.c.bf16 %v292_v18, %v291_v17  ;;  %v99_v22 = vld [vmem:[#allocation7] sm:$0xff]  ;;  %s3834_s25 = smov 12   ;;  %s3835_s26 = smov 16   ;;  %vm3082_vm6 = vcmask 162816  }
  0x5f   :  { %3563 = vmatprep.subr.bf16.mxu0 %v3562_v12  ;;  %3362 = vmatprep.mubr.msk.f32.mxu0 %vm112_vm0, %v95_v13  ;;  %v100_v23 = vld [vmem:[#allocation7 + $0x8] sm:$0xff]  ;;  %v3208_v25 = vld [vmem:[%s4339_s4 + $0x1] ss:$0 sm:$0xff]  ;;  %v3204_v27 = vld [vmem:[%s4339_s4] ss:$0 sm:$0xff]  ;;  %s3836_s28 = smov 20  }
  0x60   :  { %v3212_v37 = vld [vmem:[%s4339_s4 + $0x2] ss:$0 sm:$0xff]  ;;  %s3833_s4 = smov 4   ;;  %s3837_s29 = smov 24   ;;  %vm3085_vm7 = vcmask 195584   ;;  %vm3088_vm8 = vcmask 228352  }
  0x61   :  { %3573 = vmatpush3.bf16.msra.mxu1 %v3570_v8  ;;  %s3838_s8 = smov 28   ;;  %s3839_s11 = smov [#allocation11]  }
  0x62   :  { %3565 = vmatpush3.bf16.msra.mxu0 %v3562_v12  ;;  %3387 = vmatprep.subr.mxu1 %v3824_v24  ;;  %s3190_s12 = sshll.u32 %s3839_s11, 4  ;;  %s3191_s12 = int_to_ptr.vmem [resolvable:$true] %s3190_s12 }
  0x63   :  { %3575 = vmatprep.subr.bf16.mxu0 %v3574_v16  ;;  %s3787_s15 = scalar_lea.vmem %s3191_s12, 256  ;;  %p3792_p13 = scmp.lt.s32.totalorder %s3191_s12, %s3191_s12 }
  0x64   :  { %3374 = vmatmul.mubr.msk.f32.vlgmr.msra.gmra.mrb[0].mxu1 %vm112_vm0, %v98_v19  ;;  %p3788_p12 = scmp.ne.s32.totalorder %s3191_s12, %s3787_s15  ;;  %p3793_p0 = scmp.lt.s32.totalorder %s3787_s15, %s3787_s15 }
  0x65   :  { %3363 = vmatmul.mubr.msk.f32.vlgmr.msra.gmra.mrb[0].mxu0 %vm112_vm0, %v96_v20  ;;  %3389 = vmatprep.mubr.msk.f32.mxu1 %vm3825_vm1, %v3824_v24 }
  0x66   :  { %3577 = vmatpush3.bf16.msra.mxu0 %v3574_v16  ;;  %3384 = vmatprep.mubr.msk.f32.mxu0 %vm112_vm0, %v99_v22  ;;  %p3794_p1 = por %p3793_p0, %p3792_p13 }
  0x67   :  { %3579 = vmatprep.subr.bf16.mxu0 %v3578_v21 }
  0x68   :  { %p3795_p2 = pnand %p3794_p1, %p3788_p12 }
  0x6a   :  { %3581 = vmatpush3.bf16.msra.mxu0 %v3578_v21 }
  0x6b   :  { %3407 = vmatprep.subr.mxu0 %v3824_v24 }
  0x6d   :  { %3385 = vmatmul.mubr.msk.f32.vlgmr.msra.gmra.mrb[2].mxu0 %vm112_vm0, %v100_v23 }
  0x6e   :  { %3409 = vmatprep.mubr.msk.f32.mxu0 %vm3825_vm1, %v3824_v24 }
 0x137   :  { %v3375_v26 = vpop.f32.mrb[0].mxu1 }
 0x138   :  { %v285_v28 = vadd.f32 %v3375_v26, %v3208_v25  ;;  %v279_v29 = vpop.f32.mrb[1].mxu1  ;;  %v3364_v30 = vpop.f32.mrb[0].mxu0 }
 0x139   :  { %v280_v31 = vadd.f32 %v3208_v25, %v279_v29  ;;  %v185_v32 = vpop.f32.mrb[1].mxu0  ;;  %v191_v33 = vadd.f32 %v3364_v30, %v3204_v27 }
 0x13a   :  { %416 = vrot.lane.b32.xlu1 %v285_v28, %s3826_s18  ;;  %v186_v34 = vadd.f32 %v3204_v27, %v185_v32 }
 0x13b   :  { %414 = vrot.lane.b32.xlu0 %v280_v31, %s3826_s18  ;;  %3388 = vmatpush3.xpose.msk.msra.mxu1 %vm486_vm2, %v280_v31 }
 0x13c   :  { %3392 = vmatprep.subr.mxu1 %v3824_v24 }
 0x13e   :  { %386 = vrot.lane.b32.xlu1 %v191_v33, %s3826_s18  ;;  %3390 = vmatmul.mubr.msk.f32.vlgmr.msra.gmra.mrb[2].mxu1 %vm486_vm2, %v186_v34 }
 0x13f   :  { %384 = vrot.lane.b32.xlu0 %v186_v34, %s3826_s18  ;;  %3393 = vmatpush3.xpose.msk.msra.mxu1 %vm486_vm2, %v285_v28 }
 0x140   :  { %3394 = vmatprep.mubr.msk.f32.mxu1 %vm3825_vm1, %v3824_v24  ;;  %3397 = vmatprep.subr.mxu1 %v3824_v24  ;;  %v3386_v35 = vpop.f32.mrb[2].mxu0 }
 0x141   :  { %v373_v36 = vpop.f32.mrb[3].mxu0  ;;  %v4015_v38 = vadd.f32 %v3386_v35, %v3212_v37 }
 0x142   :  { %420 = vrot.lane.b32.xlu1 %v285_v28, %s3827_s19  ;;  %3395 = vmatmul.mubr.msk.f32.vlgmr.msra.gmra.mrb[4].mxu1 %vm486_vm2, %v191_v33  ;;  %v4022_v39 = vadd.f32 %v3212_v37, %v373_v36 }
 0x143   :  { %418 = vrot.lane.b32.xlu0 %v280_v31, %s3827_s19  ;;  %3399 = vmatprep.mubr.msk.f32.mxu1 %vm3825_vm1, %v3824_v24 }
 0x146   :  { %390 = vrot.lane.b32.xlu1 %v191_v33, %s3827_s19 }
 0x147   :  { %388 = vrot.lane.b32.xlu0 %v186_v34, %s3827_s19 }
 0x14a   :  { %424 = vrot.lane.b32.xlu1 %v285_v28, %s3828_s20 }
 0x14b   :  { %422 = vrot.lane.b32.xlu0 %v280_v31, %s3828_s20 }
 0x14e   :  { %394 = vrot.lane.b32.xlu1 %v191_v33, %s3828_s20 }
 0x14f   :  { %392 = vrot.lane.b32.xlu0 %v186_v34, %s3828_s20 }
 0x152   :  { %428 = vrot.lane.b32.xlu1 %v285_v28, %s3829_s21 }
 0x153   :  { %426 = vrot.lane.b32.xlu0 %v280_v31, %s3829_s21 }
 0x156   :  { %398 = vrot.lane.b32.xlu1 %v191_v33, %s3829_s21 }
 0x157   :  { %396 = vrot.lane.b32.xlu0 %v186_v34, %s3829_s21 }
 0x15a   :  { %432 = vrot.lane.b32.xlu1 %v285_v28, %s3830_s22 }
 0x15b   :  { %430 = vrot.lane.b32.xlu0 %v280_v31, %s3830_s22 }
 0x15e   :  { %402 = vrot.lane.b32.xlu1 %v191_v33, %s3830_s22 }
 0x15f   :  { %400 = vrot.lane.b32.xlu0 %v186_v34, %s3830_s22 }
 0x162   :  { %436 = vrot.lane.b32.xlu1 %v285_v28, %s3831_s23 }
 0x163   :  { %434 = vrot.lane.b32.xlu0 %v280_v31, %s3831_s23 }
 0x166   :  { %406 = vrot.lane.b32.xlu1 %v191_v33, %s3831_s23 }
 0x167   :  { %404 = vrot.lane.b32.xlu0 %v186_v34, %s3831_s23 }
 0x16a   :  { %440 = vrot.lane.b32.xlu1 %v285_v28, %s3832_s24 }
 0x16b   :  { %438 = vrot.lane.b32.xlu0 %v280_v31, %s3832_s24 }
 0x16e   :  { %410 = vrot.lane.b32.xlu1 %v191_v33, %s3832_s24 }
 0x16f   :  { %408 = vrot.lane.b32.xlu0 %v186_v34, %s3832_s24 }
 0x172   :  { %452 = vrot.lane.b32.xlu1 %v4015_v38, %s3827_s19 }
 0x173   :  { %446 = vrot.lane.b32.xlu0 %v4015_v38, %s3826_s18 }
 0x176   :  { %458 = vrot.lane.b32.xlu1 %v4015_v38, %s3828_s20 }
 0x177   :  { %456 = vrot.lane.b32.xlu0 %v4022_v39, %s3828_s20 }
 0x17a   :  { %464 = vrot.lane.b32.xlu1 %v4015_v38, %s3829_s21 }
 0x17b   :  { %462 = vrot.lane.b32.xlu0 %v4022_v39, %s3829_s21 }
 0x17e   :  { %470 = vrot.lane.b32.xlu1 %v4015_v38, %s3830_s22 }
 0x17f   :  { %468 = vrot.lane.b32.xlu0 %v4022_v39, %s3830_s22 }
 0x182   :  { %476 = vrot.lane.b32.xlu1 %v4015_v38, %s3831_s23 }
 0x183   :  { %474 = vrot.lane.b32.xlu0 %v4022_v39, %s3831_s23 }
 0x186   :  { %444 = vrot.lane.b32.xlu1 %v4022_v39, %s3826_s18 }
 0x18a   :  { %450 = vrot.lane.b32.xlu1 %v4022_v39, %s3827_s19 }
 0x1ac   :  { %v417_v40 = vpop.permute.xlu1 %416 }
 0x1ad   :  { %v415_v41 = vpop.permute.xlu0 %414 }
 0x1ae   :  { %3398 = vmatpush3.xpose.msk.msra.mxu1 %vm486_vm2, %v415_v41 }
 0x1af   :  { %3402 = vmatprep.subr.mxu1 %v3824_v24 }
 0x1b0   :  { %v387_v42 = vpop.permute.xlu1 %386 }
 0x1b1   :  { %v385_v43 = vpop.permute.xlu0 %384 }
 0x1b2   :  { %3400 = vmatmul.mubr.msk.f32.vlgmr.msra.gmra.mrb[6].mxu1 %vm486_vm2, %v385_v43 }
 0x1b3   :  { %3403 = vmatpush3.xpose.msk.msra.mxu1 %vm486_vm2, %v417_v40  ;;  %3404 = vmatprep.mubr.msk.f32.mxu1 %vm3825_vm1, %v3824_v24 }
 0x1b4   :  { %v421_v44 = vpop.permute.xlu1 %420  ;;  %3412 = vmatprep.subr.mxu1 %v3824_v24 }
 0x1b5   :  { %v419_v45 = vpop.permute.xlu0 %418 }
 0x1b6   :  { %3405 = vmatmul.mubr.msk.f32.vlgmr.msra.gmra.mrb[8].mxu1 %vm486_vm2, %v387_v42  ;;  %3408 = vmatpush3.xpose.msk.msra.mxu0 %vm486_vm2, %v419_v45 }
 0x1b7   :  { %3413 = vmatpush3.xpose.msk.msra.mxu1 %vm486_vm2, %v421_v44  ;;  %3414 = vmatprep.mubr.msk.f32.mxu1 %vm3825_vm1, %v3824_v24 }
 0x1b8   :  { %v391_v46 = vpop.permute.xlu1 %390  ;;  %3422 = vmatprep.subr.mxu1 %v3824_v24  ;;  %3417 = vmatprep.subr.mxu0 %v3824_v24 }
 0x1b9   :  { %v389_v47 = vpop.permute.xlu0 %388 }
 0x1ba   :  { %3410 = vmatmul.mubr.msk.f32.vlgmr.msra.gmra.mrb[4].mxu0 %vm486_vm2, %v389_v47  ;;  %3415 = vmatmul.mubr.msk.f32.vlgmr.msra.gmra.mrb[10].mxu1 %vm486_vm2, %v391_v46 }
 0x1bb   :  { %3424 = vmatprep.mubr.msk.f32.mxu1 %vm3825_vm1, %v3824_v24  ;;  %3419 = vmatprep.mubr.msk.f32.mxu0 %vm3825_vm1, %v3824_v24 }
 0x1bc   :  { %v425_v48 = vpop.permute.xlu1 %424 }
 0x1bd   :  { %v423_v49 = vpop.permute.xlu0 %422  ;;  %3423 = vmatpush3.xpose.msk.msra.mxu1 %vm486_vm2, %v425_v48 }
 0x1be   :  { %3418 = vmatpush3.xpose.msk.msra.mxu0 %vm486_vm2, %v423_v49  ;;  %3432 = vmatprep.subr.mxu1 %v3824_v24 }
 0x1bf   :  { %3427 = vmatprep.subr.mxu0 %v3824_v24 }
 0x1c0   :  { %v395_v50 = vpop.permute.xlu1 %394 }
 0x1c1   :  { %v393_v51 = vpop.permute.xlu0 %392  ;;  %3425 = vmatmul.mubr.msk.f32.vlgmr.msra.gmra.mrb[12].mxu1 %vm486_vm2, %v395_v50 }
 0x1c2   :  { %3420 = vmatmul.mubr.msk.f32.vlgmr.msra.gmra.mrb[6].mxu0 %vm486_vm2, %v393_v51  ;;  %3434 = vmatprep.mubr.msk.f32.mxu1 %vm3825_vm1, %v3824_v24 }
 0x1c3   :  { %3429 = vmatprep.mubr.msk.f32.mxu0 %vm3825_vm1, %v3824_v24 }
 0x1c4   :  { %v429_v52 = vpop.permute.xlu1 %428 }
 0x1c5   :  { %v427_v53 = vpop.permute.xlu0 %426  ;;  %3433 = vmatpush3.xpose.msk.msra.mxu1 %vm486_vm2, %v429_v52 }
 0x1c6   :  { %3428 = vmatpush3.xpose.msk.msra.mxu0 %vm486_vm2, %v427_v53  ;;  %3442 = vmatprep.subr.mxu1 %v3824_v24 }
 0x1c7   :  { %3437 = vmatprep.subr.mxu0 %v3824_v24 }
 0x1c8   :  { %v399_v54 = vpop.permute.xlu1 %398 }
 0x1c9   :  { %v397_v55 = vpop.permute.xlu0 %396  ;;  %3435 = vmatmul.mubr.msk.f32.vlgmr.msra.gmra.mrb[14].mxu1 %vm486_vm2, %v399_v54 }
 0x1ca   :  { %3430 = vmatmul.mubr.msk.f32.vlgmr.msra.gmra.mrb[8].mxu0 %vm486_vm2, %v397_v55  ;;  %3444 = vmatprep.mubr.msk.f32.mxu1 %vm3825_vm1, %v3824_v24 }
 0x1cb   :  { %3439 = vmatprep.mubr.msk.f32.mxu0 %vm3825_vm1, %v3824_v24 }
 0x1cc   :  { %v433_v56 = vpop.permute.xlu1 %432 }
 0x1cd   :  { %v431_v57 = vpop.permute.xlu0 %430  ;;  %3443 = vmatpush3.xpose.msk.msra.mxu1 %vm486_vm2, %v433_v56 }
 0x1ce   :  { %3438 = vmatpush3.xpose.msk.msra.mxu0 %vm486_vm2, %v431_v57  ;;  %3452 = vmatprep.subr.mxu1 %v3824_v24 }
 0x1cf   :  { %3447 = vmatprep.subr.mxu0 %v3824_v24 }
 0x1d0   :  { %v403_v58 = vpop.permute.xlu1 %402 }
 0x1d1   :  { %v401_v59 = vpop.permute.xlu0 %400  ;;  %3445 = vmatmul.mubr.msk.f32.vlgmr.msra.gmra.mrb[16].mxu1 %vm486_vm2, %v403_v58 }
 0x1d2   :  { %3440 = vmatmul.mubr.msk.f32.vlgmr.msra.gmra.mrb[10].mxu0 %vm486_vm2, %v401_v59  ;;  %3454 = vmatprep.mubr.msk.f32.mxu1 %vm3825_vm1, %v3824_v24 }
 0x1d3   :  { %3449 = vmatprep.mubr.msk.f32.mxu0 %vm3825_vm1, %v3824_v24 }
 0x1d4   :  { %v437_v60 = vpop.permute.xlu1 %436 }
 0x1d5   :  { %v435_v61 = vpop.permute.xlu0 %434  ;;  %3453 = vmatpush3.xpose.msk.msra.mxu1 %vm486_vm2, %v437_v60 }
 0x1d6   :  { %3448 = vmatpush3.xpose.msk.msra.mxu0 %vm486_vm2, %v435_v61  ;;  %3462 = vmatprep.subr.mxu1 %v3824_v24 }
 0x1d7   :  { %3457 = vmatprep.subr.mxu0 %v3824_v24 }
 0x1d8   :  { %v407_v62 = vpop.permute.xlu1 %406 }
 0x1d9   :  { %v405_v63 = vpop.permute.xlu0 %404  ;;  %3455 = vmatmul.mubr.msk.f32.vlgmr.msra.gmra.mrb[18].mxu1 %vm486_vm2, %v407_v62 }
 0x1da   :  { %3450 = vmatmul.mubr.msk.f32.vlgmr.msra.gmra.mrb[12].mxu0 %vm486_vm2, %v405_v63  ;;  %3464 = vmatprep.mubr.msk.f32.mxu1 %vm3825_vm1, %v3824_v24 }
 0x1db   :  { %3459 = vmatprep.mubr.msk.f32.mxu0 %vm3825_vm1, %v3824_v24 }
 0x1dc   :  { %v441_v0 = vpop.permute.xlu1 %440 }
 0x1dd   :  { %v439_v1 = vpop.permute.xlu0 %438  ;;  %3463 = vmatpush3.xpose.msk.msra.mxu1 %vm486_vm2, %v441_v0 }
 0x1de   :  { %3458 = vmatpush3.xpose.msk.msra.mxu0 %vm486_vm2, %v439_v1  ;;  %3472 = vmatprep.subr.mxu1 %v3824_v24 }
 0x1df   :  { %3467 = vmatprep.subr.mxu0 %v3824_v24 }
 0x1e0   :  { %v411_v2 = vpop.permute.xlu1 %410 }
 0x1e1   :  { %v409_v3 = vpop.permute.xlu0 %408  ;;  %3465 = vmatmul.mubr.msk.f32.vlgmr.msra.gmra.mrb[20].mxu1 %vm486_vm2, %v411_v2 }
 0x1e2   :  { %3460 = vmatmul.mubr.msk.f32.vlgmr.msra.gmra.mrb[14].mxu0 %vm486_vm2, %v409_v3  ;;  %3473 = vmatpush3.msra.mxu1 %v4015_v38 }
 0x1e3   :  { %3468 = vmatpush3.msra.mxu0 %v4022_v39  ;;  %3469 = vmatprep.mubr.msk.f32.mxu0 %vm3825_vm1, %v3824_v24 }
 0x1e4   :  { %3474 = vmatprep.mubr.msk.f32.mxu1 %vm3825_vm1, %v3824_v24  ;;  %3477 = vmatprep.subr.mxu0 %v3824_v24  ;;  %v4114_v10 = vpop.permute.xlu1 %452 }
 0x1e5   :  { %3482 = vmatprep.subr.mxu1 %v3824_v24  ;;  %v4118_v12 = vpop.permute.xlu0 %446 }
 0x1e8   :  { %v4116_v11 = vpop.permute.xlu1 %458 }
 0x1e9   :  { %v4126_v17 = vpop.permute.xlu0 %456 }
 0x1ec   :  { %v4122_v14 = vpop.permute.xlu1 %464 }
 0x1ed   :  { %v4134_v22 = vpop.permute.xlu0 %462 }
 0x1f0   :  { %v4132_v21 = vpop.permute.xlu1 %470 }
 0x1f1   :  { %v4148_v32 = vpop.permute.xlu0 %468 }
 0x1f4   :  { %v4144_v30 = vpop.permute.xlu1 %476 }
 0x1f5   :  { %v4156_v41 = vpop.permute.xlu0 %474 }
 0x1f8   :  { %v445_v40 = vpop.permute.xlu1 %444 }
 0x1fc   :  { %v4166_v48 = vpop.permute.xlu1 %450 }
 0x211   :  { %v557_v4 = vpop.f32.mrb[2].mxu1 }
 0x212   :  { %v3391_v5 = vpop.f32.mrb[3].mxu1  ;;  %v1672_v6 = vsel %vm1671_vm3, %v557_v4, -inf }
 0x213   :  { %1673 = vmax.xlane.f32.xlu0 %v1672_v6 }
 0x215   :  { %v631_v7 = vpop.f32.mrb[4].mxu1 }
 0x216   :  { %v3396_v8 = vpop.f32.mrb[5].mxu1  ;;  %v1675_v9 = vsel %vm1671_vm3, %v631_v7, -inf }
 0x217   :  { %1676 = vmax.xlane.f32.xlu1 %v1675_v9 }
 0x285   :  { %v4120_v13 = vpop.f32.mrb[6].mxu1 }
 0x286   :  { %v3401_v15 = vpop.f32.mrb[7].mxu1  ;;  %v1678_v16 = vsel %vm1671_vm3, %v4120_v13, -inf }
 0x287   :  { %1679 = vmax.xlane.f32.xlu0 %v1678_v16 }
 0x289   :  { %v4128_v18 = vpop.f32.mrb[8].mxu1 }
 0x28a   :  { %v3406_v19 = vpop.f32.mrb[9].mxu1  ;;  %v1681_v20 = vsel %vm1671_vm3, %v4128_v18, -inf }
 0x28b   :  { %1682 = vmax.xlane.f32.xlu0 %v1681_v20 }
 0x28d   :  { %v4136_v23 = vpop.f32.mrb[4].mxu0  ;;  %v4138_v25 = vpop.f32.mrb[10].mxu1 }
 0x28e   :  { %v3411_v26 = vpop.f32.mrb[5].mxu0  ;;  %v3416_v27 = vpop.f32.mrb[11].mxu1  ;;  %v1684_v28 = vsel %vm1671_vm3, %v4136_v23, -inf  ;;  %v1687_v29 = vsel %vm1671_vm3, %v4138_v25, -inf }
 0x28f   :  { %1685 = vmax.xlane.f32.xlu1 %v1684_v28  ;;  %1688 = vmax.xlane.f32.xlu0 %v1687_v29 }
 0x294   :  { %v4146_v31 = vpop.f32.mrb[12].mxu1 }
 0x295   :  { %v4150_v33 = vpop.f32.mrb[6].mxu0  ;;  %v3426_v34 = vpop.f32.mrb[13].mxu1  ;;  %v1693_v35 = vsel %vm1671_vm3, %v4146_v31, -inf }
 0x296   :  { %v3421_v36 = vpop.f32.mrb[7].mxu0  ;;  %1694 = vmax.xlane.f32.xlu0 %v1693_v35  ;;  %v1690_v37 = vsel %vm1671_vm3, %v4150_v33, -inf }
 0x297   :  { %1691 = vmax.xlane.f32.xlu1 %v1690_v37 }
 0x29c   :  { %v4158_v42 = vpop.f32.mrb[14].mxu1 }
 0x29d   :  { %v4160_v43 = vpop.f32.mrb[8].mxu0  ;;  %v3436_v44 = vpop.f32.mrb[15].mxu1  ;;  %v1699_v45 = vsel %vm1671_vm3, %v4158_v42, -inf }
 0x29e   :  { %v3431_v46 = vpop.f32.mrb[9].mxu0  ;;  %1700 = vmax.xlane.f32.xlu0 %v1699_v45  ;;  %v1696_v47 = vsel %vm1671_vm3, %v4160_v43, -inf }
 0x29f   :  { %1697 = vmax.xlane.f32.xlu1 %v1696_v47 }
 0x2a0   :  { %v1674_v49 = vpop.xlane.xlu0 %1673 }
 0x2a1   :  { %v1720_v50 = vsub.f32 %v557_v4, %v1674_v49 }
 0x2a3   :  { %v1736_v51 = vmul.f32 1.442695, %v1720_v50 }
 0x2a4   :  { %v1677_v52 = vpop.xlane.xlu1 %1676  ;;  %v4168_v53 = vpop.f32.mrb[16].mxu1 }
 0x2a5   :  { %3613 = vpow2.f32 %v1736_v51  ;;  %v1721_v54 = vsub.f32 %v631_v7, %v1677_v52  ;;  %v4170_v55 = vpop.f32.mrb[10].mxu0  ;;  %v3446_v56 = vpop.f32.mrb[17].mxu1  ;;  %v1705_v57 = vsel %vm1671_vm3, %v4168_v53, -inf }
 0x2a6   :  { %v3441_v58 = vpop.f32.mrb[11].mxu0  ;;  %1706 = vmax.xlane.f32.xlu0 %v1705_v57  ;;  %v1702_v59 = vsel %vm1671_vm3, %v4170_v55, -inf }
 0x2a7   :  { %v1738_v60 = vmul.f32 1.442695, %v1721_v54  ;;  %1703 = vmax.xlane.f32.xlu1 %v1702_v59 }
 0x2a9   :  { %3615 = vpow2.f32 %v1738_v60 }
 0x2ac   :  { %v4176_v61 = vpop.f32.mrb[18].mxu1 }
 0x2ad   :  { %v4178_v62 = vpop.f32.mrb[12].mxu0  ;;  %v3456_v63 = vpop.f32.mrb[19].mxu1  ;;  %v1711_v0 = vsel %vm1671_vm3, %v4176_v61, -inf }
 0x2ae   :  { %v3451_v1 = vpop.f32.mrb[13].mxu0  ;;  %1712 = vmax.xlane.f32.xlu0 %v1711_v0  ;;  %v1708_v2 = vsel %vm1671_vm3, %v4178_v62, -inf }
 0x2af   :  { %v4184_v3 = vpop.eup %3613  ;;  %1709 = vmax.xlane.f32.xlu1 %v1708_v2 }
 0x2b0   :  { %3470 = vmatmul.mubr.msk.f32.vlgmr.msra.gmra.mrb[16].mxu0 %vm1671_vm3, %v4184_v3 }
 0x2b1   :  { %3478 = vmatpush3.msra.mxu0 %v445_v40  ;;  %3479 = vmatprep.mubr.msk.f32.mxu0 %vm3825_vm1, %v3824_v24 }
 0x2b2   :  { %3487 = vmatprep.subr.mxu0 %v3824_v24 }
 0x2b3   :  { %v4191_v4 = vpop.eup %3615 }
 0x2b4   :  { %v4193_v5 = vpop.f32.mrb[20].mxu1  ;;  %3475 = vmatmul.mubr.msk.f32.vlgmr.msra.gmra.mrb[22].mxu1 %vm1671_vm3, %v4191_v4 }
 0x2b5   :  { %v4197_v6 = vpop.f32.mrb[14].mxu0  ;;  %v3466_v7 = vpop.f32.mrb[21].mxu1  ;;  %v1717_v8 = vsel %vm1671_vm3, %v4193_v5, -inf  ;;  %3483 = vmatpush3.msra.mxu1 %v4118_v12  ;;  %3484 = vmatprep.mubr.msk.f32.mxu1 %vm3825_vm1, %v3824_v24 }
 0x2b6   :  { %v3461_v9 = vpop.f32.mrb[15].mxu0  ;;  %1718 = vmax.xlane.f32.xlu0 %v1717_v8  ;;  %v1714_v15 = vsel %vm1671_vm3, %v4197_v6, -inf  ;;  %3492 = vmatprep.subr.mxu1 %v3824_v24 }
 0x2b7   :  { %1715 = vmax.xlane.f32.xlu1 %v1714_v15 }
 0x2c8   :  { %482 = vrot.lane.b32.xlu1 %v4015_v38, %s3832_s24 }
 0x2cc   :  { %480 = vrot.lane.b32.xlu0 %v4022_v39, %s3832_s24 }
 0x314   :  { %v1680_v16 = vpop.xlane.xlu0 %1679 }
 0x315   :  { %v1722_v12 = vsub.f32 %v4120_v13, %v1680_v16 }
 0x317   :  { %v1740_v19 = vmul.f32 1.442695, %v1722_v12 }
 0x318   :  { %v1683_v20 = vpop.xlane.xlu0 %1682 }
 0x319   :  { %3617 = vpow2.f32 %v1740_v19  ;;  %v1723_v26 = vsub.f32 %v4128_v18, %v1683_v20 }
 0x31b   :  { %v1742_v27 = vmul.f32 1.442695, %v1723_v26 }
 0x31c   :  { %v1686_v28 = vpop.xlane.xlu1 %1685  ;;  %v1689_v29 = vpop.xlane.xlu0 %1688 }
 0x31d   :  { %3619 = vpow2.f32 %v1742_v27  ;;  %v1724_v34 = vsub.f32 %v4136_v23, %v1686_v28  ;;  %v1725_v35 = vsub.f32 %v4138_v25, %v1689_v29 }
 0x31f   :  { %v1744_v38 = vmul.f32 1.442695, %v1724_v34  ;;  %v1746_v36 = vmul.f32 1.442695, %v1725_v35 }
 0x321   :  { %3621 = vpow2.f32 %v1744_v38 }
 0x322   :  { %3623 = vpow2.f32 %v1746_v36  ;;  %v1771_v36 = vsel %vm1671_vm3, %v4191_v4, 0.0 }
 0x323   :  { %v3618_v39 = vpop.eup %3617  ;;  %v1695_v37 = vpop.xlane.xlu0 %1694 }
 0x324   :  { %v1727_v13 = vsub.f32 %v4146_v31, %v1695_v37  ;;  %v1692_v40 = vpop.xlane.xlu1 %1691  ;;  %3480 = vmatmul.mubr.msk.f32.vlgmr.msra.gmra.mrb[18].mxu0 %vm1671_vm3, %v3618_v39  ;;  %v1774_v18 = vsel %vm1671_vm3, %v3618_v39, 0.0  ;;  %v1768_v39 = vsel %vm1671_vm3, %v4184_v3, 0.0 }
 0x325   :  { %v1726_v44 = vsub.f32 %v4150_v33, %v1692_v40  ;;  %3488 = vmatpush3.msra.mxu0 %v4166_v48  ;;  %1775 = vadd.xlane.f32.xlu0 %v1774_v18 }
 0x326   :  { %v1750_v23 = vmul.f32 1.442695, %v1727_v13  ;;  %3489 = vmatprep.mubr.msk.f32.mxu0 %vm3825_vm1, %v3824_v24  ;;  %3497 = vmatprep.subr.mxu0 %v3824_v24 }
 0x327   :  { %v3620_v25 = vpop.eup %3619  ;;  %v1748_v45 = vmul.f32 1.442695, %v1726_v44 }
 0x328   :  { %3625 = vpow2.f32 %v1750_v23  ;;  %3485 = vmatmul.mubr.msk.f32.vlgmr.msra.gmra.mrb[24].mxu1 %vm1671_vm3, %v3620_v25  ;;  %v1777_v31 = vsel %vm1671_vm3, %v3620_v25, 0.0 }
 0x329   :  { %3627 = vpow2.f32 %v1748_v45  ;;  %3493 = vmatpush3.msra.mxu1 %v4114_v10  ;;  %1778 = vadd.xlane.f32.xlu1 %v1777_v31 }
 0x32a   :  { %3494 = vmatprep.mubr.msk.f32.mxu1 %vm3825_vm1, %v3824_v24  ;;  %3502 = vmatprep.subr.mxu1 %v3824_v24 }
 0x32b   :  { %v3622_v33 = vpop.eup %3621  ;;  %v1701_v46 = vpop.xlane.xlu0 %1700 }
 0x32c   :  { %v3624_v47 = vpop.eup %3623  ;;  %v1729_v48 = vsub.f32 %v4158_v42, %v1701_v46  ;;  %v1698_v49 = vpop.xlane.xlu1 %1697  ;;  %3490 = vmatmul.mubr.msk.f32.vlgmr.msra.gmra.mrb[20].mxu0 %vm1671_vm3, %v3622_v33  ;;  %v1780_v50 = vsel %vm1671_vm3, %v3622_v33, 0.0 }
 0x32d   :  { %v1728_v51 = vsub.f32 %v4160_v43, %v1698_v49  ;;  %3495 = vmatmul.mubr.msk.f32.vlgmr.msra.gmra.mrb[26].mxu1 %vm1671_vm3, %v3624_v47  ;;  %3498 = vmatpush3.msra.mxu0 %v4126_v17  ;;  %v1783_v42 = vsel %vm1671_vm3, %v3624_v47, 0.0 }
 0x32e   :  { %v1754_v10 = vmul.f32 1.442695, %v1729_v48  ;;  %3503 = vmatpush3.msra.mxu1 %v4116_v11  ;;  %1781 = vadd.xlane.f32.xlu0 %v1780_v50 }
 0x32f   :  { %v1752_v52 = vmul.f32 1.442695, %v1728_v51  ;;  %3504 = vmatprep.mubr.msk.f32.mxu1 %vm3825_vm1, %v3824_v24  ;;  %3512 = vmatprep.subr.mxu1 %v3824_v24 }
 0x330   :  { %3629 = vpow2.f32 %v1754_v10  ;;  %3499 = vmatprep.mubr.msk.f32.mxu0 %vm3825_vm1, %v3824_v24  ;;  %3507 = vmatprep.subr.mxu0 %v3824_v24 }
 0x331   :  { %3631 = vpow2.f32 %v1752_v52 }
 0x332   :  { %v3626_v17 = vpop.eup %3625  ;;  %1784 = vadd.xlane.f32.xlu0 %v1783_v42 }
 0x333   :  { %v3628_v43 = vpop.eup %3627  ;;  %3505 = vmatmul.mubr.msk.f32.vlgmr.msra.gmra.mrb[28].mxu1 %vm1671_vm3, %v3626_v17  ;;  %v1707_v11 = vpop.xlane.xlu0 %1706  ;;  %v1789_v54 = vsel %vm1671_vm3, %v3626_v17, 0.0 }
 0x334   :  { %3513 = vmatpush3.msra.mxu1 %v4122_v14  ;;  %v1731_v56 = vsub.f32 %v4168_v53, %v1707_v11  ;;  %v1704_v57 = vpop.xlane.xlu1 %1703  ;;  %3500 = vmatmul.mubr.msk.f32.vlgmr.msra.gmra.mrb[22].mxu0 %vm1671_vm3, %v3628_v43  ;;  %v1786_v58 = vsel %vm1671_vm3, %v3628_v43, 0.0 }
 0x335   :  { %v1730_v59 = vsub.f32 %v4170_v55, %v1704_v57  ;;  %3508 = vmatpush3.msra.mxu0 %v4134_v22  ;;  %1787 = vadd.xlane.f32.xlu1 %v1786_v58 }
 0x336   :  { %v1758_v60 = vmul.f32 1.442695, %v1731_v56  ;;  %1790 = vadd.xlane.f32.xlu0 %v1789_v54  ;;  %3514 = vmatprep.mubr.msk.f32.mxu1 %vm3825_vm1, %v3824_v24 }
 0x337   :  { %v1756_v63 = vmul.f32 1.442695, %v1730_v59  ;;  %3522 = vmatprep.subr.mxu1 %v3824_v24  ;;  %3509 = vmatprep.mubr.msk.f32.mxu0 %vm3825_vm1, %v3824_v24 }
 0x338   :  { %3633 = vpow2.f32 %v1758_v60  ;;  %3517 = vmatprep.subr.mxu0 %v3824_v24 }
 0x339   :  { %3635 = vpow2.f32 %v1756_v63 }
 0x33a   :  { %v3630_v14 = vpop.eup %3629 }
 0x33b   :  { %v3632_v53 = vpop.eup %3631  ;;  %3515 = vmatmul.mubr.msk.f32.vlgmr.msra.gmra.mrb[30].mxu1 %vm1671_vm3, %v3630_v14  ;;  %v1713_v22 = vpop.xlane.xlu0 %1712  ;;  %v1795_v55 = vsel %vm1671_vm3, %v3630_v14, 0.0 }
 0x33c   :  { %3523 = vmatpush3.msra.mxu1 %v4132_v21  ;;  %v1733_v0 = vsub.f32 %v4176_v61, %v1713_v22  ;;  %v1710_v1 = vpop.xlane.xlu1 %1709  ;;  %3510 = vmatmul.mubr.msk.f32.vlgmr.msra.gmra.mrb[24].mxu0 %vm1671_vm3, %v3632_v53  ;;  %v1792_v2 = vsel %vm1671_vm3, %v3632_v53, 0.0 }
 0x33d   :  { %v1732_v7 = vsub.f32 %v4178_v62, %v1710_v1  ;;  %3518 = vmatpush3.msra.mxu0 %v4148_v32  ;;  %1796 = vadd.xlane.f32.xlu0 %v1795_v55 }
 0x33e   :  { %v1762_v8 = vmul.f32 1.442695, %v1733_v0  ;;  %1793 = vadd.xlane.f32.xlu1 %v1792_v2  ;;  %3524 = vmatprep.mubr.msk.f32.mxu1 %vm3825_vm1, %v3824_v24 }
 0x33f   :  { %v1760_v9 = vmul.f32 1.442695, %v1732_v7  ;;  %3532 = vmatprep.subr.mxu1 %v3824_v24  ;;  %3519 = vmatprep.mubr.msk.f32.mxu0 %vm3825_vm1, %v3824_v24 }
 0x340   :  { %3637 = vpow2.f32 %v1762_v8  ;;  %3527 = vmatprep.subr.mxu0 %v3824_v24 }
 0x341   :  { %3639 = vpow2.f32 %v1760_v9 }
 0x342   :  { %v3634_v21 = vpop.eup %3633 }
 0x343   :  { %v3636_v61 = vpop.eup %3635  ;;  %3525 = vmatmul.mubr.msk.f32.vlgmr.msra.gmra.mrb[32].mxu1 %vm1671_vm3, %v3634_v21  ;;  %v1719_v32 = vpop.xlane.xlu0 %1718  ;;  %v1801_v62 = vsel %vm1671_vm3, %v3634_v21, 0.0 }
 0x344   :  { %3533 = vmatpush3.msra.mxu1 %v4144_v30  ;;  %v1735_v15 = vsub.f32 %v4193_v5, %v1719_v32  ;;  %v1716_v16 = vpop.xlane.xlu1 %1715  ;;  %3520 = vmatmul.mubr.msk.f32.vlgmr.msra.gmra.mrb[26].mxu0 %vm1671_vm3, %v3636_v61  ;;  %v1798_v12 = vsel %vm1671_vm3, %v3636_v61, 0.0 }
 0x345   :  { %v1734_v19 = vsub.f32 %v4197_v6, %v1716_v16  ;;  %3528 = vmatpush3.msra.mxu0 %v4156_v41  ;;  %1802 = vadd.xlane.f32.xlu0 %v1801_v62 }
 0x346   :  { %v1766_v20 = vmul.f32 1.442695, %v1735_v15  ;;  %1799 = vadd.xlane.f32.xlu1 %v1798_v12  ;;  %3534 = vmatprep.mubr.msk.f32.mxu1 %vm3825_vm1, %v3824_v24  ;;  %v3091_v12 = vld [vmem:[#allocation10] sm:$0xff] }
 0x347   :  { %v1764_v26 = vmul.f32 1.442695, %v1734_v19  ;;  %3542 = vmatprep.subr.mxu1 %v3824_v24  ;;  %3529 = vmatprep.mubr.msk.f32.mxu0 %vm3825_vm1, %v3824_v24  ;;  %v481_v27 = vpop.permute.xlu0 %480  ;;  %v3092_v19 = vld [vmem:[#allocation10 + $0x8] sm:$0xff] }
 0x348   :  { %3641 = vpow2.f32 %v1766_v20  ;;  %3537 = vmatprep.subr.mxu0 %v3824_v24  ;;  %v483_v6 = vpop.permute.xlu1 %482  ;;  %v3093_v20 = vld [vmem:[#allocation10 + $0x10] sm:$0xff] }
 0x349   :  { %3643 = vpow2.f32 %v1764_v26 }
 0x34a   :  { %v3638_v30 = vpop.eup %3637 }
 0x34b   :  { %v3640_v5 = vpop.eup %3639  ;;  %3535 = vmatmul.mubr.msk.f32.vlgmr.msra.gmra.mrb[34].mxu1 %vm1671_vm3, %v3638_v30  ;;  %v1807_v41 = vsel %vm1671_vm3, %v3638_v30, 0.0 }
 0x34c   :  { %3543 = vmatpush3.msra.mxu1 %v483_v6  ;;  %3530 = vmatmul.mubr.msk.f32.vlgmr.msra.gmra.mrb[28].mxu0 %vm1671_vm3, %v3640_v5  ;;  %v1804_v28 = vsel %vm1671_vm3, %v3640_v5, 0.0  ;;  %v3582_v5 = vpack.c.bf16 %v3092_v19, %v3091_v12  ;;  %v3094_v6 = vld [vmem:[#allocation10 + $0x18] sm:$0xff] }
 0x34d   :  { %1808 = vadd.xlane.f32.xlu0 %v1807_v41  ;;  %3538 = vmatpush3.msra.mxu0 %v481_v27 }
 0x34e   :  { %1805 = vadd.xlane.f32.xlu1 %v1804_v28  ;;  %3544 = vmatprep.mubr.msk.f32.mxu1 %vm3825_vm1, %v3824_v24 }
 0x34f   :  { %3539 = vmatprep.mubr.msk.f32.mxu0 %vm3825_vm1, %v3824_v24  ;;  %3583 = vmatprep.subr.bf16.mxu0 %v3582_v5 }
 0x352   :  { %v3642_v29 = vpop.eup %3641 }
 0x353   :  { %v3644_v34 = vpop.eup %3643  ;;  %3545 = vmatmul.mubr.msk.f32.vlgmr.msra.gmra.mrb[36].mxu1 %vm1671_vm3, %v3642_v29  ;;  %v1813_v35 = vsel %vm1671_vm3, %v3642_v29, 0.0 }
 0x354   :  { %1814 = vadd.xlane.f32.xlu0 %v1813_v35  ;;  %3540 = vmatmul.mubr.msk.f32.vlgmr.msra.gmra.mrb[30].mxu0 %vm1671_vm3, %v3644_v34  ;;  %v1810_v38 = vsel %vm1671_vm3, %v3644_v34, 0.0  ;;  %v3586_v34 = vpack.c.bf16 %v3094_v6, %v3093_v20  ;;  %v3263_v20 = vld [vmem:[%s4341_s6] ss:$0 sm:$0xff] }
 0x355   :  { %1811 = vadd.xlane.f32.xlu1 %v1810_v38  ;;  %3585 = vmatpush3.bf16.msra.mxu0 %v3582_v5 }
 0x356   :  { %3587 = vmatprep.subr.bf16.mxu0 %v3586_v34 }
 0x358   :  { %1772 = vadd.xlane.f32.xlu0 %v1771_v36 }
 0x359   :  { %1769 = vadd.xlane.f32.xlu1 %v1768_v39  ;;  %3589 = vmatpush3.bf16.msra.mxu0 %v3586_v34 }
 0x383   :  { %v4301_v24 = vpop.f32.mrb[16].mxu0 }
 0x384   :  { %v3471_v37 = vpop.f32.mrb[17].mxu0 }
 0x387   :  { %v4303_v13 = vpop.f32.mrb[22].mxu1 }
 0x388   :  { %v3476_v40 = vpop.f32.mrb[23].mxu1 }
 0x3b2   :  { %v1776_v18 = vpop.xlane.xlu0 %1775 }
 0x3b3   :  { %3645 = vrcp.f32 %v1776_v18 }
 0x3b6   :  { %v1779_v23 = vpop.xlane.xlu1 %1778 }
 0x3b7   :  { %3647 = vrcp.f32 %v1779_v23 }
 0x3bb   :  { %v1782_v44 = vpop.xlane.xlu0 %1781 }
 0x3bc   :  { %3649 = vrcp.f32 %v1782_v44 }
 0x3bd   :  { %v3646_v45 = vpop.eup %3645 }
 0x3bf   :  { %v1785_v25 = vpop.xlane.xlu0 %1784 }
 0x3c0   :  { %3651 = vrcp.f32 %v1785_v25 }
 0x3c1   :  { %v3648_v47 = vpop.eup %3647 }
 0x3c2   :  { %v1788_v46 = vpop.xlane.xlu1 %1787 }
 0x3c3   :  { %v1791_v3 = vpop.xlane.xlu0 %1790 }
 0x3c4   :  { %3653 = vrcp.f32 %v1791_v3 }
 0x3c5   :  { %3655 = vrcp.f32 %v1788_v46 }
 0x3c6   :  { %v3650_v51 = vpop.eup %3649 }
 0x3ca   :  { %v1797_v43 = vpop.xlane.xlu0 %1796  ;;  %v3652_v56 = vpop.eup %3651 }
 0x3cb   :  { %v1794_v54 = vpop.xlane.xlu1 %1793  ;;  %3657 = vrcp.f32 %v1797_v43 }
 0x3cc   :  { %3659 = vrcp.f32 %v1794_v54 }
 0x3ce   :  { %v3654_v58 = vpop.eup %3653 }
 0x3cf   :  { %v3656_v60 = vpop.eup %3655 }
 0x3d2   :  { %v1803_v0 = vpop.xlane.xlu0 %1802 }
 0x3d3   :  { %v1800_v1 = vpop.xlane.xlu1 %1799  ;;  %3661 = vrcp.f32 %v1803_v0 }
 0x3d4   :  { %3663 = vrcp.f32 %v1800_v1 }
 0x3d5   :  { %v3658_v2 = vpop.eup %3657 }
 0x3d6   :  { %v3660_v8 = vpop.eup %3659 }
 0x3da   :  { %v1809_v15 = vpop.xlane.xlu0 %1808 }
 0x3db   :  { %v1806_v16 = vpop.xlane.xlu1 %1805  ;;  %3665 = vrcp.f32 %v1809_v15 }
 0x3dc   :  { %3667 = vrcp.f32 %v1806_v16 }
 0x3dd   :  { %v3662_v26 = vpop.eup %3661 }
 0x3de   :  { %v3664_v41 = vpop.eup %3663 }
 0x3e1   :  { %v1815_v36 = vpop.xlane.xlu0 %1814 }
 0x3e2   :  { %v1812_v39 = vpop.xlane.xlu1 %1811  ;;  %3669 = vrcp.f32 %v1815_v36 }
 0x3e3   :  { %3671 = vrcp.f32 %v1812_v39 }
 0x3e5   :  { %v3666_v37 = vpop.eup %3665 }
 0x3e6   :  { %v3668_v18 = vpop.eup %3667 }
 0x3f7   :  { %v2031_v4 = vpop.f32.mrb[18].mxu0 }
 0x3f8   :  { %v3002_v31 = vmul.f32 %v3646_v45, %v2031_v4  ;;  %v3481_v33 = vpop.f32.mrb[19].mxu0 }
 0x3fa   :  { %3018 = vrot.lane.b32.xlu1 %v3002_v31, %s3833_s4  ;;  %v3670_v31 = vpop.eup %3669 }
 0x3fb   :  { %v2104_v48 = vpop.f32.mrb[24].mxu1  ;;  %v3672_v3 = vpop.eup %3671 }
 0x3fc   :  { %v3003_v49 = vmul.f32 %v3648_v47, %v2104_v48  ;;  %v3486_v50 = vpop.f32.mrb[25].mxu1 }
 0x3fe   :  { %3020 = vrot.lane.b32.xlu0 %v3003_v49, %s3833_s4 }
 0x3ff   :  { %v2177_v10 = vpop.f32.mrb[20].mxu0 }
 0x400   :  { %v3004_v52 = vmul.f32 %v3650_v51, %v2177_v10  ;;  %v2250_v42 = vpop.f32.mrb[26].mxu1  ;;  %v3491_v17 = vpop.f32.mrb[21].mxu0 }
 0x401   :  { %v3496_v11 = vpop.f32.mrb[27].mxu1  ;;  %v3005_v57 = vmul.f32 %v3652_v56, %v2250_v42  ;;  %v1770_v51 = vpop.xlane.xlu1 %1769 }
 0x402   :  { %3026 = vrot.lane.b32.xlu1 %v3004_v52, %s3820_s14  ;;  %v1773_v42 = vpop.xlane.xlu0 %1772  ;;  %3673 = vrcp.f32 %v1770_v51 }
 0x403   :  { %3675 = vrcp.f32 %v1773_v42 }
 0x406   :  { %3028 = vrot.lane.b32.xlu1 %v3005_v57, %s3820_s14  ;;  %v2396_v59 = vpop.f32.mrb[28].mxu1 }
 0x407   :  { %v3007_v63 = vmul.f32 %v3654_v58, %v2396_v59  ;;  %v2323_v14 = vpop.f32.mrb[22].mxu0  ;;  %v3506_v53 = vpop.f32.mrb[29].mxu1 }
 0x408   :  { %v3006_v22 = vmul.f32 %v3656_v60, %v2323_v14  ;;  %v3501_v55 = vpop.f32.mrb[23].mxu0 }
 0x40a   :  { %3034 = vrot.lane.b32.xlu0 %v3006_v22, %s3834_s25  ;;  %3036 = vrot.lane.b32.xlu1 %v3007_v63, %s3834_s25 }
 0x40c   :  { %v3674_v58 = vpop.eup %3673 }
 0x40d   :  { %v3676_v59 = vpop.eup %3675  ;;  %v3000_v14 = vmul.f32 %v3674_v58, %v4301_v24 }
 0x40e   :  { %v2542_v7 = vpop.f32.mrb[30].mxu1  ;;  %v3001_v53 = vmul.f32 %v3676_v59, %v4303_v13 }
 0x40f   :  { %v3009_v9 = vmul.f32 %v3658_v2, %v2542_v7  ;;  %v2469_v21 = vpop.f32.mrb[24].mxu0  ;;  %v3516_v61 = vpop.f32.mrb[31].mxu1 }
 0x410   :  { %v3008_v32 = vmul.f32 %v3660_v8, %v2469_v21  ;;  %v3511_v62 = vpop.f32.mrb[25].mxu0 }
 0x411   :  { %3044 = vrot.lane.b32.xlu1 %v3009_v9, %s3835_s26 }
 0x412   :  { %3042 = vrot.lane.b32.xlu0 %v3008_v32, %s3835_s26 }
 0x416   :  { %v2688_v30 = vpop.f32.mrb[32].mxu1 }
 0x417   :  { %v3011_v27 = vmul.f32 %v3662_v26, %v2688_v30  ;;  %v2615_v28 = vpop.f32.mrb[26].mxu0  ;;  %v3526_v29 = vpop.f32.mrb[33].mxu1 }
 0x418   :  { %v3010_v35 = vmul.f32 %v3664_v41, %v2615_v28  ;;  %v3521_v38 = vpop.f32.mrb[27].mxu0 }
 0x419   :  { %3052 = vrot.lane.b32.xlu1 %v3011_v27, %s3836_s28 }
 0x41a   :  { %3050 = vrot.lane.b32.xlu0 %v3010_v35, %s3836_s28 }
 0x41e   :  { %v2834_v40 = vpop.f32.mrb[34].mxu1 }
 0x41f   :  { %v3013_v44 = vmul.f32 %v3666_v37, %v2834_v40  ;;  %v2761_v23 = vpop.f32.mrb[28].mxu0  ;;  %v3536_v25 = vpop.f32.mrb[35].mxu1 }
 0x420   :  { %v3012_v45 = vmul.f32 %v3668_v18, %v2761_v23  ;;  %v3531_v4 = vpop.f32.mrb[29].mxu0 }
 0x421   :  { %3060 = vrot.lane.b32.xlu1 %v3013_v44, %s3837_s29 }
 0x422   :  { %3058 = vrot.lane.b32.xlu0 %v3012_v45, %s3837_s29 }
 0x426   :  { %v2980_v33 = vpop.f32.mrb[36].mxu1 }
 0x427   :  { %v3015_v46 = vmul.f32 %v3670_v31, %v2980_v33  ;;  %v2907_v47 = vpop.f32.mrb[30].mxu0  ;;  %v3546_v48 = vpop.f32.mrb[37].mxu1 }
 0x428   :  { %v3014_v49 = vmul.f32 %v3672_v3, %v2907_v47  ;;  %v3541_v50 = vpop.f32.mrb[31].mxu0 }
 0x429   :  { %3068 = vrot.lane.b32.xlu1 %v3015_v46, %s3838_s8 }
 0x42a   :  { %3066 = vrot.lane.b32.xlu0 %v3014_v49, %s3838_s8 }
 0x46c   :  { %v3019_v10 = vpop.permute.xlu1 %3018 }
 0x46d   :  { %v3072_v22 = vsel %vm486_vm2, %v3000_v14, %v3019_v10 }
 0x470   :  { %v3021_v43 = vpop.permute.xlu0 %3020 }
 0x471   :  { %v3073_v0 = vsel %vm486_vm2, %v3001_v53, %v3021_v43 }
 0x474   :  { %v3027_v52 = vpop.permute.xlu1 %3026 }
 0x475   :  { %v3074_v1 = vsel %vm1671_vm3, %v3072_v22, %v3027_v52 }
 0x478   :  { %v3029_v17 = vpop.permute.xlu1 %3028 }
 0x479   :  { %v3075_v7 = vsel %vm1671_vm3, %v3073_v0, %v3029_v17 }
 0x47c   :  { %v3037_v11 = vpop.permute.xlu1 %3036  ;;  %v3035_v54 = vpop.permute.xlu0 %3034 }
 0x47d   :  { %v3077_v8 = vsel %vm3076_vm4, %v3074_v1, %v3035_v54  ;;  %v3078_v9 = vsel %vm3076_vm4, %v3075_v7, %v3037_v11 }
 0x483   :  { %v3045_v56 = vpop.permute.xlu1 %3044 }
 0x484   :  { %v3043_v57 = vpop.permute.xlu0 %3042  ;;  %v3081_v24 = vsel %vm3079_vm5, %v3078_v9, %v3045_v56 }
 0x485   :  { %v3080_v21 = vsel %vm3079_vm5, %v3077_v8, %v3043_v57 }
 0x48b   :  { %v3053_v60 = vpop.permute.xlu1 %3052 }
 0x48c   :  { %v3051_v63 = vpop.permute.xlu0 %3050  ;;  %v3084_v32 = vsel %vm3082_vm6, %v3081_v24, %v3053_v60 }
 0x48d   :  { %v3083_v13 = vsel %vm3082_vm6, %v3080_v21, %v3051_v63 }
 0x493   :  { %v3061_v55 = vpop.permute.xlu1 %3060 }
 0x494   :  { %v3059_v2 = vpop.permute.xlu0 %3058  ;;  %v3087_v16 = vsel %vm3085_vm7, %v3084_v32, %v3061_v55 }
 0x495   :  { %v3086_v62 = vsel %vm3085_vm7, %v3083_v13, %v3059_v2 }
 0x49b   :  { %v3069_v61 = vpop.permute.xlu1 %3068 }
 0x49c   :  { %v3067_v15 = vpop.permute.xlu0 %3066  ;;  %v3090_v19 = vsel %vm3088_vm8, %v3087_v16, %v3069_v61 }
 0x49d   :  { %v3089_v12 = vsel %vm3088_vm8, %v3086_v62, %v3067_v15 }
 0x49e   :  { %3555 = vmatprep.mubr.msk.f32.mxu0 %vm112_vm0, %v3089_v12 }
 0x49f   :  { %3556 = vmatmul.mubr.msk.f32.vlgmr.msra.gmra.mrb[32].mxu0 %vm112_vm0, %v3090_v19 }
 0x572   :  { %v3557_v26 = vpop.f32.mrb[32].mxu0 }
 0x573   :  { %v3180_v30 = vadd.f32 %v3557_v26, %v3263_v20  ;;  %v3174_v5 = vpop.f32.mrb[33].mxu0 }
 0x574   :  { %v3175_v6 = vadd.f32 %v3263_v20, %v3174_v5 }
 0x575   :  { %3184 = vst.msk [vmem:[#allocation11 + $0x8] sm:$0xff] %vm112_vm0, %v3180_v30 }
 0x576   :  { %3183 = vst.msk [vmem:[#allocation11] sm:$0xff] %vm112_vm0, %v3175_v6 }
 0x577   :  { %3798 = shalt.err (!%p3795_p2)
}
 0x578   :  { %s3799_s2 = scalar_lea.hbm %s4342_s7, 256 }
 0x579   :  { %p3800_p3 = scmp.ne.s32.totalorder %s4342_s7, %s3799_s2  ;;  %p3803_p4 = scmp.lt.u32.totalorder %s3799_s2, %s4342_s7 }
 0x57b   :  { %p3805_p5 = pnand %p3803_p4, %p3800_p3 }
 0x57d   :  { %3808 = shalt.err (!%p3805_p5)
}
 0x57e   :  { %3196 = dma.vmem_to_hbm [thread:$0]  %s3191_s12, 256, %s4342_s7, [#allocation4], %s3819_s13, %s3819_s13, %s3820_s14  }
 0x57f   :  { %3815 = dma.done.wait [#allocation4], 256  }
 0x580   :  { %3816 = vsyncadd [#allocation4], 4294967040 }
 0x581   :  { %3200 = vsyncpa [#allocation3], 1 }
 0x582   :  { %3201 = vsyncpa [#allocation6], 1 }
 0x583   :  { %3202 = vsyncpa [#allocation9], 1 }
 0x584   :  { %3203 = vsyncpa [#allocation4], 1 }

</bundles_post_ra>
